<compile_context>
chip_gen: v7x
topology: tpu7x:2x2x1
jax: 0.10.0
libtpu: 0.0.40
codegen_flags: <defaults>
</compile_context>

<pallas_src>
import jax
import jax.numpy as jnp
from jax.experimental import pallas as pl
from jax.experimental.pallas import tpu as pltpu

_MiB = 1024 * 1024


def _round_up(n, m):
    return ((n + m - 1) // m) * m


def _largest_divisor_tile(total, base, max_tile):
    """Largest multiple of `base` that divides `total` and is <= max_tile.

    `total` must itself be a multiple of `base`.
    """
    max_tile = max(base, min(max_tile, total))
    best = base
    t = base
    while t <= max_tile:
        if total % t == 0:
            best = t
        t += base
    return best


def _vmem_plan():
    """(pipelined_tile_budget_bytes, vmem_limit_bytes) per TPU generation."""
    kind = ""
    try:
        kind = jax.devices()[0].device_kind.lower()
    except Exception:  # pragma: no cover - defensive; fall back to conservative plan
        pass
    if "v7" in kind:
        # 64 MiB physical VMEM per TensorCore: keep well under it.
        return 40 * _MiB, 56 * _MiB
    if "v6" in kind or "trillium" in kind:
        # 128 MiB physical, 32 MiB scoped default: raise the limit, big tiles.
        return 64 * _MiB, 96 * _MiB
    if "v5" in kind:
        # v5e: 128 MiB physical but 16 MiB scoped default; raise explicitly.
        return 32 * _MiB, 64 * _MiB
    # Unknown device: conservative plan that fits every generation.
    return 24 * _MiB, 48 * _MiB


def _select_tiles(rows_p, hw_p, itemsize, w_itemsize, pipeline_budget):
    """Pick (tile_r, tile_hw): lane dim first, then rows, within VMEM budget."""
    # Lane (last) dimension first: multiple of 128, up to 8192, such that even a
    # minimal 8-row tile (6 buffers in flight) still fits the budget.
    max_hw_by_budget = pipeline_budget // (6 * 8 * itemsize)
    max_hw = max(128, min(8192, (max_hw_by_budget // 128) * 128))
    tile_hw = _largest_divisor_tile(hw_p, 128, max_hw)

    # Then grow rows to fill the budget: 6 data tiles + double-buffered
    # (tile_r, 1) weight column padded to 128 lanes.
    per_row_bytes = 6 * tile_hw * itemsize + 2 * 128 * w_itemsize
    max_r_by_budget = max(8, pipeline_budget // per_row_bytes)
    max_r = max(8, min(2048, (max_r_by_budget // 8) * 8))
    tile_r = _largest_divisor_tile(rows_p, 8, max_r)

    # Guarantee >= 2 blocks on a parallel axis (so a v7x megacore can shard);
    # harmless elsewhere (~0.35 us extra per grid step).
    if rows_p // tile_r == 1 and hw_p // tile_hw == 1:
        if hw_p >= 256:
            tile_hw = _largest_divisor_tile(hw_p, 128, hw_p // 2)
        elif rows_p >= 16:
            tile_r = _largest_divisor_tile(rows_p, 8, rows_p // 2)
    return tile_r, tile_hw


def ia_gate_kernel(w_ref, x_ref, xout_ref, delta_ref):
    # w_ref : (TILE_R, 1)        per-row weight = tanh(Linear(IA_head))
    # x_ref : (TILE_R, TILE_HW)  rows of the flattened (N*C, H*W) input
    wgt = w_ref[...]
    x = x_ref[...]
    delta = wgt * x                               # one vmul per vreg
    delta_ref[...] = delta.astype(delta_ref.dtype)
    xout_ref[...] = (delta + x).astype(xout_ref.dtype)   # (1 + w) * x == x + w*x


def ia_gate_dp_vis(x, ia_head, w, b):
    """x: (N, C, H, W), ia_head: (N, in_dim), w: (C, in_dim), b: (C,)."""
    N, C, H, W = x.shape
    HW = H * W
    rows = N * C

    # Tiny Linear + tanh hoisted off the per-tile hot path (plain XLA).
    weight = jnp.tanh(ia_head @ w.T + b).astype(x.dtype)   # (N, C), keep x.dtype
    w2 = weight.reshape(rows, 1)
    x2 = x.reshape(rows, HW)

    # Pad to (8, 128) granularity so every shape keeps lane-dense, pipelined tiles.
    rows_p = _round_up(rows, 8)
    hw_p = _round_up(HW, 128)
    if rows_p != rows or hw_p != HW:
        x2 = jnp.pad(x2, ((0, rows_p - rows), (0, hw_p - HW)))
        w2 = jnp.pad(w2, ((0, rows_p - rows), (0, 0)))

    itemsize = jnp.dtype(x.dtype).itemsize
    w_itemsize = jnp.dtype(w2.dtype).itemsize
    pipeline_budget, vmem_limit = _vmem_plan()
    tile_r, tile_hw = _select_tiles(rows_p, hw_p, itemsize, w_itemsize,
                                    pipeline_budget)
    grid = (rows_p // tile_r, hw_p // tile_hw)

    cost = pl.CostEstimate(
        flops=2 * rows * HW,                       # 1 mul + 1 add per element
        transcendentals=0,                         # tanh hoisted to the wrapper
        bytes_accessed=3 * rows * HW * itemsize + rows * w_itemsize,
    )

    x_spec = pl.BlockSpec((tile_r, tile_hw), lambda i, j: (i, j))
    w_spec = pl.BlockSpec((tile_r, 1), lambda i, j: (i, 0))

    x_out2, delta2 = pl.pallas_call(
        ia_gate_kernel,
        out_shape=(
            jax.ShapeDtypeStruct((rows_p, hw_p), x.dtype),
            jax.ShapeDtypeStruct((rows_p, hw_p), x.dtype),
        ),
        grid=grid,
        in_specs=[w_spec, x_spec],
        out_specs=(x_spec, x_spec),
        compiler_params=pltpu.CompilerParams(
            dimension_semantics=("parallel", "parallel"),
            vmem_limit_bytes=vmem_limit,
        ),
        cost_estimate=cost,
    )(w2, x2)

    if rows_p != rows or hw_p != HW:
        x_out2 = x_out2[:rows, :HW]
        delta2 = delta2[:rows, :HW]
    return x_out2.reshape(N, C, H, W), delta2.reshape(N, C, H, W)


def _reference(x, ia_head, w, b):
    a = ia_head @ w.T + b
    weight = jnp.tanh(a)
    delta = weight[:, :, None, None] * x
    gate = 1.0 + jnp.tanh(a)
    return gate[:, :, None, None] * x, delta


if __name__ == "__main__":
    # Small shapes consistent with the module: x is NCHW with C == out_dim,
    # IA_head is (N, in_dim).
    N, C, H, W = 2, 4, 16, 16      # out_dim = C = 4
    in_dim = 32

    key = jax.random.PRNGKey(0)
    kx, kh, kw, kb = jax.random.split(key, 4)
    x = jax.random.normal(kx, (N, C, H, W), dtype=jnp.float32)
    ia_head = jax.random.normal(kh, (N, in_dim), dtype=jnp.float32)
    # Deterministic Linear(in_dim, out_dim) parameters.
    w = jax.random.normal(kw, (C, in_dim), dtype=jnp.float32) * 0.1
    b = jax.random.normal(kb, (C,), dtype=jnp.float32) * 0.1

    x_out, delta = ia_gate_dp_vis(x, ia_head, w, b)
    jax.block_until_ready((x_out, delta))

    x_ref, d_ref = _reference(x, ia_head, w, b)
    assert jnp.allclose(x_out, x_ref, atol=1e-5, rtol=1e-5)
    assert jnp.allclose(delta, d_ref, atol=1e-5, rtol=1e-5)

    print("KERNEL_OK")
</pallas_src>

<mosaic_0001>
module attributes {stable_mosaic.version = 11 : i64} {
  func.func @ia_gate_kernel(%arg0: i32, %arg1: i32, %arg2: memref<8x1xf32, #tpu.memory_space<vmem>>, %arg3: memref<8x128xf32, #tpu.memory_space<vmem>>, %arg4: memref<8x128xf32, #tpu.memory_space<vmem>>, %arg5: memref<8x128xf32, #tpu.memory_space<vmem>>) attributes {dimension_semantics = [#tpu.dimension_semantics<parallel>, #tpu.dimension_semantics<parallel>], iteration_bounds = array<i64: 1, 2>, scalar_prefetch = 0 : i64, scratch_operands = 0 : i64, tpu.core_type = #tpu.core_type<tc>, window_params = [{transform_indices = @transform_0, window_bounds = array<i64: 8, 1>}, {transform_indices = @transform_1, window_bounds = array<i64: 8, 128>}, {transform_indices = @transform_2, window_bounds = array<i64: 8, 128>}, {transform_indices = @transform_3, window_bounds = array<i64: 8, 128>}]} {
    %c0 = arith.constant 0 : index
    %c0_0 = arith.constant 0 : index
    %0 = vector.load %arg2[%c0, %c0_0] : memref<8x1xf32, #tpu.memory_space<vmem>>, vector<8x1xf32>
    %c0_1 = arith.constant 0 : index
    %c0_2 = arith.constant 0 : index
    %1 = vector.load %arg3[%c0_1, %c0_2] : memref<8x128xf32, #tpu.memory_space<vmem>>, vector<8x128xf32>
    %2 = vector.broadcast %0 : vector<8x1xf32> to vector<8x128xf32>
    %3 = arith.mulf %2, %1 : vector<8x128xf32>
    %c0_3 = arith.constant 0 : index
    %c0_4 = arith.constant 0 : index
    %4 = vector.load %arg5[%c0_3, %c0_4] : memref<8x128xf32, #tpu.memory_space<vmem>>, vector<8x128xf32>
    tpu.vector_store %arg5[%c0_3, %c0_4], %3 {strides = array<i32>} : memref<8x128xf32, #tpu.memory_space<vmem>>, vector<8x128xf32>,
    %5 = arith.addf %3, %1 : vector<8x128xf32>
    %c0_5 = arith.constant 0 : index
    %c0_6 = arith.constant 0 : index
    %6 = vector.load %arg4[%c0_5, %c0_6] : memref<8x128xf32, #tpu.memory_space<vmem>>, vector<8x128xf32>
    tpu.vector_store %arg4[%c0_5, %c0_6], %5 {strides = array<i32>} : memref<8x128xf32, #tpu.memory_space<vmem>>, vector<8x128xf32>,
    return
  }
  func.func @transform_0(%arg0: i32, %arg1: i32) -> (i32, i32) {
    %c0_i32 = arith.constant 0 : i32
    %c0_i32_0 = arith.constant 0 : i32
    return %arg0, %c0_i32 : i32, i32
  }
  func.func @transform_1(%arg0: i32, %arg1: i32) -> (i32, i32) {
    %c0_i32 = arith.constant 0 : i32
    return %arg0, %arg1 : i32, i32
  }
  func.func @transform_2(%arg0: i32, %arg1: i32) -> (i32, i32) {
    %c0_i32 = arith.constant 0 : i32
    return %arg0, %arg1 : i32, i32
  }
  func.func @transform_3(%arg0: i32, %arg1: i32) -> (i32, i32) {
    %c0_i32 = arith.constant 0 : i32
    return %arg0, %arg1 : i32, i32
  }
}

</mosaic_0001>

<bundles_post_ra>
// kernel: tpu_custom_call.1
= control target key start
LH: loop header
LB: loop body
LE: loop exit
PB: predicated region body
PF: predicated region fallthrough
CT: control target
= control target key end

     0   :  { %9 = vsyncpa [#allocation3], 0  ;;  %s881_s0 = inlined_call_operand.vmem [shape: f32[8,1], index: 0, kind: input, shape index: {}]   ;;  %s882_s1 = inlined_call_operand.hbm [shape: f32[8,256], index: 1, kind: input, shape index: {}]   ;;  %s883_s2 = inlined_call_operand.hbm [shape: f32[8,256], index: 2, kind: output, shape index: {0}]   ;;  %s884_s3 = inlined_call_operand.hbm [shape: f32[8,256], index: 3, kind: output, shape index: {1}]  }
   0x1   :  { %11 = vsyncpa [#allocation3 + $0x1], 0 }
   0x2   :  { %12 = vsyncpa [#allocation4], 0 }
   0x3   :  { %14 = vsyncpa [#allocation4 + $0x1], 0 }
   0x4   :  { %15 = vsyncpa [#allocation7], 0 }
   0x5   :  { %17 = vsyncpa [#allocation7 + $0x1], 0  ;;  %s668_s12 = smov 0   ;;  %s670_s13 = smov 0  }
   0x6   :  { %s672_s14 = smov 0   ;;  %s674_s15 = smov 0  }
   0x7   :  { %s676_s16 = smov 0   ;;  %s678_s17 = smov 0  }
   0x8 LB: > { %s412_s18 = sadd.s32 4294967295, %s642_s17   ;;  %s413_s19 = sadd.s32 4294967294, %s642_s17   ;;  %s642_s17 = sphi %s678_s17, %s23_s17   ;;  %s638_s16 = sphi %s676_s16, %s900_s16   ;;  %s634_s15 = sphi %s674_s15, %s899_s15   ;;  %s630_s14 = sphi %s672_s14, %s898_s14   ;;  %s626_s13 = sphi %s670_s13, %s897_s13   ;;  %s622_s12 = sphi %s668_s12, %s896_s12  }
   0x9   : > { %s32_s20 = sadd.s32 1, %s638_s16  ;;  %s70_s21 = sadd.s32 1, %s630_s14 }
   0xa   : > { %p33_p0 = scmp.ge.s32.totalorder %s32_s20, 2  ;;  %p77_p1 = scmp.ne.s32.totalorder %s630_s14, %s626_s13 }
   0xb   : > { %p78_p2 = scmp.eq.s32.totalorder %s642_s17, 0  ;;  %p83_p3 = scmp.ne.s32.totalorder %s626_s13, %s622_s12 }
   0xc   : > { %s902_s20 = smov (%p33_p0, %s32_s20), 0  ;;  %p84_p5 = scmp.eq.s32.totalorder %s412_s18, 0 }
   0xd   : > { %p709_p4 = por %p78_p2, %p77_p1  ;;  %s66_s23 = ssub.s32 %s638_s16, %s902_s20 }
   0xe   : > { %p109_p6 = scmp.eq.s32.totalorder %s412_s18, 1  ;;  %p68_p7 = scmp.eq.s32.totalorder %s66_s23, 0 }
   0xf   : > { %p715_p8 = por %p84_p5, %p83_p3  ;;  %p115_p10 = scmp.eq.s32.totalorder %s413_s19, 1 }
  0x10   : > { %p719_p9 = por %p109_p6, %p77_p1  ;;  %p446_p13 = scmp.lt.s32.totalorder %s642_s17, 2 }
  0x11   : > { %s724_s26 = scalar_select %p68_p7, %s630_s14, %s70_s21  }
  0x12   : > { %s888_s25 = scalar_select %p719_p9, 1, 0 }
  0x13   : > { %p726_p11 = por %p115_p10, %p83_p3  ;;  %s170_s28 = sand.u32 1, %s630_s14  }
  0x14   : > { %s417_s29 = sshll.u32 %s170_s28, 3  ;;  %s418_s30 = sshll.u32 %s638_s16, 7 }
  0x15   : > { %s889_s27 = scalar_select %p726_p11, 1, 0 }
  0x16   : > { %s737_s6 = scalar_lea.hbm %s882_s1, %s418_s30  ;;  %s174_s7 = scalar_lea.vmem [#allocation2], %s417_s29 }
  0x17   : > { %s183_s8 = sshll.u32 %s174_s7, 4  ;;  %p743_p0 = pnand %p446_p13, %p709_p4  ;;  %s739_s8 = int_to_ptr.vmem [resolvable:$true] %s183_s8 }
  0x18   : > { %s171_s10 = scalar_lea.sflag [#allocation3], %s170_s28  ;;  %s498_s11 = scalar_lea.hbm %s737_s6, 128 }
  0x19   : > { %p499_p3 = scmp.ne.s32.totalorder %s737_s6, %s498_s11  ;;  %p500_p5 = pneg %p743_p0 }
  0x1a   : > { %s503_s21 = scalar_lea.hbm %s882_s1, 256  ;;  %p504_p4 = scmp.lt.u32.totalorder %s737_s6, %s882_s1 }
  0x1b   : > { %p501_p6 = pnand %p500_p5, %p499_p3  ;;  %p505_p10 = scmp.lt.u32.totalorder %s503_s21, %s498_s11 }
  0x1c   : > { %p507_p12 = scmp.lt.u32.totalorder %s498_s11, %s737_s6 }
  0x1d   : > { %p502_p7 = pneg %p501_p6  ;;  %p506_p13 = por %p505_p10, %p504_p4 }
  0x1f   : > { %p508_p1 = por %p507_p12, %p506_p13 }
  0x21   : > { %p509_p2 = pnand %p508_p1, %p502_p7 }
  0x23   : > { %512 = shalt.err (!%p509_p2)
}
  0x24   : > { %s513_s28 = scalar_lea.vmem %s739_s8, 128  ;;  %s644_s29 = smov [#allocation2]  }
  0x25   : > { %p514_p3 = scmp.ne.s32.totalorder %s739_s8, %s513_s28  ;;  %s518_s30 = sshll.u32 %s644_s29, 4  ;;  %s519_s30 = int_to_ptr.vmem [resolvable:$false] %s518_s30 }
  0x26   : > { %s520_s4 = scalar_lea.vmem %s519_s30, 256  ;;  %p521_p9 = scmp.lt.s32.totalorder %s739_s8, %s519_s30 }
  0x27   : > { %p516_p6 = pnand %p514_p3, %p500_p5  ;;  %p522_p4 = scmp.lt.s32.totalorder %s520_s4, %s513_s28 }
  0x29   : > { %p517_p11 = pneg %p516_p6  ;;  %p523_p10 = por %p522_p4, %p521_p9 }
  0x2b   : > { %p524_p12 = pnand %p523_p10, %p517_p11 }
  0x2d   : > { %527 = shalt.err (!%p524_p12)
}
  0x2e   : > { %438 = dma.hbm_to_vmem [thread:$0]  (!%p743_p0), %s737_s6, 128, %s739_s8, %s171_s10  }
  0x2f   : > { %p891_p1 = scmp.lt.s32.totalorder %s642_s17, 3  ;;  %p892_p2 = scmp.ge.s32.totalorder %s642_s17, 1 }
  0x31   : > { %p189_p5 = pnand %p892_p2, %p891_p1 }
  0x32   : > { %s779_s5 = sand.u32 (!%p189_p5), 1, %s626_s13  }
  0x33   : > { %192 = sbr.rel (%p189_p5) target bundleno = 228 (0xe4), region = 28  ;;  %s782_s7 = sshll.u32 (!%p189_p5), %s779_s5, 3 }
  0x34   : > { %s195_s11 = scalar_lea.sflag (!%p189_p5), [#allocation3], %s779_s5  ;;  %s198_s9 = scalar_lea.vmem (!%p189_p5), [#allocation2], %s782_s7 }
  0x3a   : > { %609 = dma.done.wait (%p715_p8), %s195_s11, 128  }
  0x3b   : > { %611 = vsyncadd (%p715_p8), %s195_s11, 4294967168  ;;  %v645_v0 = vmov 0   ;;  %v234_v1 = vld [vmem:[%s881_s0] sm:$0xff]  ;;  %s425_s10 = sshll.u32 %s634_s15, 7  ;;  %s229_s18 = scalar_lea.vmem [#allocation6], %s782_s7 }
  0x3c   : > { %497 = vset.pattern.permute.xlu0 %v645_v0  ;;  %v235_v2 = vld [vmem:[%s198_s9] sm:$0xff]  ;;  %s281_s19 = sshll.u32 %s229_s18, 4  ;;  %s222_s24 = scalar_lea.vmem [#allocation5], %s782_s7  ;;  %s803_s19 = int_to_ptr.vmem [resolvable:$true] %s281_s19 }
  0x3d   : > { %238 = vperm.xlu0 %497, %v234_v1   ;;  %s266_s21 = sshll.u32 %s222_s24, 4  ;;  %s801_s28 = scalar_lea.hbm %s884_s3, %s425_s10  ;;  %s810_s21 = int_to_ptr.vmem [resolvable:$true] %s266_s21 }
  0x3e   : > { %s808_s30 = scalar_lea.hbm %s883_s2, %s425_s10  ;;  %s251_s4 = scalar_lea.sflag [#allocation7], %s779_s5 }
  0x3f   : > { %s528_s11 = scalar_lea.vmem %s803_s19, 128  ;;  %p893_p9 = scmp.ne.s32.totalorder %s888_s25, 0 }
  0x40   : > { %p529_p8 = scmp.ne.s32.totalorder %s803_s19, %s528_s11  ;;  %s646_s9 = smov [#allocation6]  }
  0x41   : > { %s532_s6 = sshll.u32 %s646_s9, 4  ;;  %s533_s6 = int_to_ptr.vmem [resolvable:$false] %s532_s6 }
  0x42   : > { %p530_p11 = pnand %p529_p8, %p893_p9  ;;  %s534_s8 = scalar_lea.vmem %s533_s6, 256 }
  0x43   : > { %p535_p7 = scmp.lt.s32.totalorder %s803_s19, %s533_s6  ;;  %p536_p13 = scmp.lt.s32.totalorder %s534_s8, %s528_s11 }
  0x44   : > { %p531_p0 = pneg %p530_p11 }
  0x45   : > { %p537_p3 = por %p536_p13, %p535_p7 }
  0x47   : > { %p538_p6 = pnand %p537_p3, %p531_p0 }
  0xbc   : > { %v239_v3 = vpop.permute.xlu0 %238 }
  0xbd   : > { %v241_v4 = vmul.f32 %v239_v3, %v235_v2 }
  0xbf   : > { %242 = vst [vmem:[%s229_s18] sm:$0xff] %v241_v4  ;;  %v243_v5 = vadd.f32 %v241_v4, %v235_v2 }
  0xc0   : > { %541 = shalt.err (!%p538_p6)
}
  0xc1   : > { %s542_s10 = scalar_lea.hbm %s801_s28, 128  ;;  %s546_s23 = scalar_lea.hbm %s884_s3, 256 }
  0xc2   : > { %p543_p4 = scmp.ne.s32.totalorder %s801_s28, %s542_s10  ;;  %p547_p1 = scmp.lt.u32.totalorder %s801_s28, %s884_s3 }
  0xc3   : > { %p548_p2 = scmp.lt.u32.totalorder %s546_s23, %s542_s10  ;;  %p550_p8 = scmp.lt.u32.totalorder %s542_s10, %s801_s28 }
  0xc4   : > { %p544_p10 = pnand %p543_p4, %p893_p9 }
  0xc5   : > { %p549_p5 = por %p548_p2, %p547_p1 }
  0xc6   : > { %p545_p12 = pneg %p544_p10 }
  0xc7   : > { %p551_p11 = por %p550_p8, %p549_p5 }
  0xc9   : > { %p552_p0 = pnand %p551_p11, %p545_p12 }
  0xcb   : > { %555 = shalt.err (!%p552_p0)
}
  0xcc   : > { %432 = dma.vmem_to_hbm [thread:$0]  (%p893_p9), %s803_s19, 128, %s801_s28, %s251_s4   ;;  %244 = vst [vmem:[%s222_s24] sm:$0xff] %v243_v5 }
  0xcd   : > { %s246_s11 = scalar_lea.sflag [#allocation4], %s779_s5  ;;  %s556_s9 = scalar_lea.vmem %s810_s21, 128 }
  0xce   : > { %p557_p7 = scmp.ne.s32.totalorder %s810_s21, %s556_s9  ;;  %s647_s6 = smov [#allocation5]  }
  0xcf   : > { %s560_s8 = sshll.u32 %s647_s6, 4  ;;  %s561_s8 = int_to_ptr.vmem [resolvable:$false] %s560_s8 }
  0xd0   : > { %p558_p13 = pnand %p557_p7, %p893_p9  ;;  %s562_s10 = scalar_lea.vmem %s561_s8, 256 }
  0xd1   : > { %p563_p6 = scmp.lt.s32.totalorder %s810_s21, %s561_s8  ;;  %p564_p4 = scmp.lt.s32.totalorder %s562_s10, %s556_s9 }
  0xd2   : > { %p559_p3 = pneg %p558_p13 }
  0xd3   : > { %p565_p10 = por %p564_p4, %p563_p6 }
  0xd5   : > { %p566_p12 = pnand %p565_p10, %p559_p3 }
  0xd7   : > { %569 = shalt.err (!%p566_p12)
}
  0xd8   : > { %s570_s5 = scalar_lea.hbm %s808_s30, 128  ;;  %s574_s24 = scalar_lea.hbm %s883_s2, 256 }
  0xd9   : > { %p571_p1 = scmp.ne.s32.totalorder %s808_s30, %s570_s5  ;;  %p575_p8 = scmp.lt.u32.totalorder %s808_s30, %s883_s2 }
  0xda   : > { %p576_p11 = scmp.lt.u32.totalorder %s574_s24, %s570_s5  ;;  %p578_p7 = scmp.lt.u32.totalorder %s570_s5, %s808_s30 }
  0xdb   : > { %p572_p2 = pnand %p571_p1, %p893_p9 }
  0xdc   : > { %p577_p0 = por %p576_p11, %p575_p8 }
  0xdd   : > { %p573_p5 = pneg %p572_p2 }
  0xde   : > { %p579_p13 = por %p578_p7, %p577_p0 }
  0xe0   : > { %p580_p3 = pnand %p579_p13, %p573_p5 }
  0xe2   : > { %583 = shalt.err (!%p580_p3)
}
  0xe3   : > { %431 = dma.vmem_to_hbm [thread:$0]  (%p893_p9), %s810_s21, 128, %s808_s30, %s246_s11  }
  0xe4 PF: > { %s293_s18 = sand.u32 1, %s622_s12   ;;  %p894_p6 = scmp.ne.s32.totalorder %s889_s27, 0 }
  0xe5   : > { %p895_p4 = scmp.ge.s32.totalorder %s642_s17, 2  ;;  %s294_s22 = scalar_lea.sflag [#allocation4], %s293_s18 }
  0xe7   : > { %p440_p10 = pnand %p895_p4, %p894_p6 }
  0xe9   : > { %613 = dma.done.wait (!%p440_p10), %s294_s22, 128  }
  0xea   : > { %615 = vsyncadd (!%p440_p10), %s294_s22, 4294967168  ;;  %s303_s23 = scalar_lea.sflag [#allocation7], %s293_s18 }
  0xeb   : > { %617 = dma.done.wait (!%p440_p10), %s303_s23, 128  }
  0xec   : > { %619 = vsyncadd (!%p440_p10), %s303_s23, 4294967168  ;;  %s23_s17 = sadd.s32 1, %s642_s17   ;;  %s896_s12 = smov %s626_s13 }
  0xed   : > { %p20_p12 = scmp.ge.s32.totalorder %s23_s17, 4   ;;  %s897_s13 = smov %s630_s14 }
  0xee   : > { %s898_s14 = smov %s724_s26  ;;  %s899_s15 = smov %s638_s16 }
  0xef   : > { %s900_s16 = smov %s902_s20  ;;  %22 = sbr.rel (!%p20_p12) target bundleno = 8 (0x8), region = 93 }
  0xf6   :  { %308 = vsyncpa [#allocation3], 1 }
  0xf7   :  { %310 = vsyncpa [#allocation3 + $0x1], 1 }
  0xf8   :  { %311 = vsyncpa [#allocation4], 1 }
  0xf9   :  { %313 = vsyncpa [#allocation4 + $0x1], 1 }
  0xfa   :  { %314 = vsyncpa [#allocation7], 1 }
  0xfb   :  { %316 = vsyncpa [#allocation7 + $0x1], 1 }

</bundles_post_ra>
